<compile_context>
chip_gen: v6e
topology: v6e:2x2x1
jax: 0.10.0
libtpu: 0.0.40
codegen_flags: <defaults>
</compile_context>

<pallas_src>
import math

import jax
import jax.numpy as jnp
from jax.experimental import pallas as pl
from jax.experimental.pallas import tpu as pltpu


def _round_up(v, m):
    return ((v + m - 1) // m) * m


def _device_defaults():
    try:
        kind = jax.devices()[0].device_kind.lower()
    except Exception:  # pragma: no cover - defensive
        kind = ""
    if "v7" in kind:
        # 64 MiB VMEM, ~3.2 TB/s HBM: bigger tiles amortize per-step overhead; 2 TCs.
        return dict(tb=512, tn=4096, vmem_limit=40 << 20, min_batch_blocks=2)
    if "v6" in kind:
        return dict(tb=512, tn=2048, vmem_limit=32 << 20, min_batch_blocks=1)
    # v5e / unknown: 4 MiB tiles double-buffered fit the 16 MiB scoped-VMEM default.
    return dict(tb=512, tn=2048, vmem_limit=None, min_batch_blocks=1)


def _make_kernel(*, TN, N, strip, w_resident):
    """Builds the kernel with all shape parameters baked in statically."""
    n_strips = TN // strip
    groups = strip // 128
    ragged = (N % TN) != 0  # last k-tile extends past the real N -> must be masked

    def _accumulate(k, x_ref, w_ref, acc_ref, masked):
        # Strip-mined VPU multiply + lane-group fold to 128 lanes; f32 accumulate in VMEM.
        for s in range(n_strips):
            lo = s * strip
            xs = x_ref[:, lo:lo + strip].astype(jnp.float32)          # (TB, strip)
            if w_resident:
                ws = w_ref[pl.ds(k, 1), lo:lo + strip].astype(jnp.float32)  # (1, strip)
            else:
                ws = w_ref[:, lo:lo + strip].astype(jnp.float32)            # (1, strip)
            prod = xs * ws
            if masked:
                # Zero out columns past the real N (clipped-DMA tail may hold garbage).
                col = (k * TN + lo
                       + jax.lax.broadcasted_iota(jnp.int32, (1, strip), 1))
                prod = jnp.where(col < N, prod, 0.0)
            part = prod[:, 0:128]
            for g in range(1, groups):
                part = part + prod[:, g * 128:(g + 1) * 128]
            acc_ref[...] += part

    def kernel(b_ref, x_ref, w_ref, o_ref, acc_ref):
        # b_ref  : (1,) SMEM scalar-prefetched bias (f32)
        # x_ref  : (TB, TN) VMEM input tile
        # w_ref  : (n_k, TN) resident weight  OR  (1, TN) streamed weight tile
        # o_ref  : (TB, 1) output tile (resident across the k axis)
        # acc_ref: (TB, 128) f32 VMEM lane-group accumulator
        k = pl.program_id(1)
        nk = pl.num_programs(1)

        @pl.when(k == 0)
        def _init():
            acc_ref[...] = jnp.zeros_like(acc_ref)

        if ragged:
            @pl.when(k < nk - 1)
            def _body():
                _accumulate(k, x_ref, w_ref, acc_ref, masked=False)

            @pl.when(k == nk - 1)
            def _tail():
                _accumulate(k, x_ref, w_ref, acc_ref, masked=True)
        else:
            _accumulate(k, x_ref, w_ref, acc_ref, masked=False)

        @pl.when(k == nk - 1)
        def _finalize():
            # Single XLU lane reduce + bias + narrow store, once per batch block.
            row = jnp.sum(acc_ref[...], axis=-1, keepdims=True)       # (TB, 1)
            o_ref[...] = (row + b_ref[0]).astype(o_ref.dtype)

    return kernel


def readout_forward_pallas(x, weight, bias, *, tb=None, tn=None):
    """Pallas path: x (B, N), weight (1, N) [PyTorch Linear layout], bias (1,) -> (B, 1)."""
    B, N = x.shape
    cfg = _device_defaults()

    # Feature-tile width (lane-aligned), batch-tile height (sublane-aligned).
    tn_d = tn if tn is not None else cfg["tn"]
    TN = min(_round_up(tn_d, 128), _round_up(N, 128))
    if tb is not None:
        TB = min(_round_up(tb, 8), _round_up(B, 8))
    else:
        # Guarantee >= min_batch_blocks blocks on the "parallel" axis (v7x megacore).
        TB = min(cfg["tb"], _round_up(pl.cdiv(B, cfg["min_batch_blocks"]), 8))
        TB = min(TB, _round_up(B, 8))

    n_bk = pl.cdiv(B, TB)
    n_k = pl.cdiv(N, TN)
    strip = math.gcd(TN, 512)

    # Weight is tiny: zero-pad it to a rectangular n_k * TN layout (x is NOT padded).
    N_w = n_k * TN
    w_flat = weight.reshape(1, N)
    if N_w != N:
        w_flat = jnp.pad(w_flat, ((0, 0), (0, N_w - N)))
    w_resident = (N_w * w_flat.dtype.itemsize) <= (2 << 20)
    if w_resident:
        w_arr = w_flat.reshape(n_k, TN)
        w_spec = pl.BlockSpec((n_k, TN), lambda i, k, b_sm: (0, 0))   # DMA'd once
    else:
        w_arr = w_flat
        w_spec = pl.BlockSpec((1, TN), lambda i, k, b_sm: (0, k))     # streamed per k

    b = bias.reshape(1).astype(jnp.float32)

    kernel = _make_kernel(TN=TN, N=N, strip=strip, w_resident=w_resident)

    out = pl.pallas_call(
        kernel,
        out_shape=jax.ShapeDtypeStruct((B, 1), x.dtype),
        grid_spec=pltpu.PrefetchScalarGridSpec(
            num_scalar_prefetch=1,                         # bias -> SMEM before the grid
            grid=(n_bk, n_k),                              # batch axis first, reduction last
            in_specs=[
                pl.BlockSpec((TB, TN), lambda i, k, b_sm: (i, k)),   # x tile
                w_spec,                                              # weight
            ],
            out_specs=pl.BlockSpec((TB, 1), lambda i, k, b_sm: (i, 0)),
            scratch_shapes=[pltpu.VMEM((TB, 128), jnp.float32)],
        ),
        compiler_params=pltpu.CompilerParams(
            dimension_semantics=("parallel", "arbitrary"),
            vmem_limit_bytes=cfg["vmem_limit"],
        ),
    )(b, x, w_arr)
    return out


def readout_forward(x, weight, bias, *, force_pallas=False, pallas_min_bytes=1 << 20):
    """ReadOutLayer.forward. Tiny problems fall back to XLA fusion (a standalone Pallas
    launch is overhead-dominated there); larger ones take the tiled Pallas path."""
    if not force_pallas and x.size * x.dtype.itemsize < pallas_min_bytes:
        y = jnp.dot(x.astype(jnp.float32), weight.reshape(-1).astype(jnp.float32))
        return (y[:, None] + bias.reshape(1).astype(jnp.float32)).astype(x.dtype)
    return readout_forward_pallas(x, weight, bias)


if __name__ == "__main__":
    key = jax.random.PRNGKey(0)
    k_x, k_w, k_b, k_x2, k_w2 = jax.random.split(key, 5)

    # Shapes implied by the module: x (batch, num_in), Linear(num_in -> 1).
    batch, num_in = 8, 32

    bound = 1.0 / jnp.sqrt(jnp.float32(num_in))
    weight = jax.random.uniform(k_w, (1, num_in), jnp.float32, -bound, bound)
    bias = jax.random.uniform(k_b, (1,), jnp.float32, -bound, bound)
    x = jax.random.normal(k_x, (batch, num_in), jnp.float32)

    out = jax.block_until_ready(readout_forward(x, weight, bias, force_pallas=True))
    ref = x @ weight.T + bias
    assert out.shape == (batch, 1)
    assert jnp.allclose(out, ref, atol=1e-5, rtol=1e-5), "mismatch vs reference (single tile)"

    # Second check with small explicit tiles and RAGGED B/N so the multi-tile grid,
    # the in-kernel N-tail mask, and the accumulate/finalize path are all exercised.
    B2, N2 = 20, 200
    x2 = jax.random.normal(k_x2, (B2, N2), jnp.float32)
    w2 = jax.random.uniform(k_w2, (1, N2), jnp.float32, -bound, bound)
    out2 = jax.block_until_ready(readout_forward_pallas(x2, w2, bias, tb=8, tn=128))
    ref2 = x2 @ w2.T + bias
    assert out2.shape == (B2, 1)
    assert jnp.allclose(out2, ref2, atol=1e-4, rtol=1e-4), "mismatch vs reference (ragged tiled)"

    print("KERNEL_OK")
</pallas_src>

<mosaic_0001>
module attributes {stable_mosaic.version = 11 : i64} {
  func.func @kernel(%arg0: i32, %arg1: i32, %arg2: memref<1xf32, #tpu.memory_space<smem>>, %arg3: memref<8x128xf32, #tpu.memory_space<vmem>>, %arg4: memref<1x128xf32, #tpu.memory_space<vmem>>, %arg5: memref<8x1xf32, #tpu.memory_space<vmem>>, %arg6: memref<8x128xf32, #tpu.memory_space<vmem>>) attributes {dimension_semantics = [#tpu.dimension_semantics<parallel>, #tpu.dimension_semantics<arbitrary>], iteration_bounds = array<i64: 1, 1>, scalar_prefetch = 1 : i64, scratch_operands = 1 : i64, tpu.core_type = #tpu.core_type<tc>, window_params = [{transform_indices = @transform_0, window_bounds = array<i64: 8, 128>}, {pipeline_mode = #tpu.pipeline_mode<synchronous>, transform_indices = @transform_1, window_bounds = array<i64: 1, 128>}, {transform_indices = @transform_2, window_bounds = array<i64: 8, 1>}]} {
    %c0_i32 = arith.constant 0 : i32
    %0 = arith.cmpi eq, %arg1, %c0_i32 : i32
    %1 = arith.extui %0 : i1 to i32
    %c0_i32_0 = arith.constant 0 : i32
    %2 = arith.cmpi ne, %1, %c0_i32_0 : i32
    scf.if %2 {
      %cst = arith.constant 0.000000e+00 : f32
      %12 = vector.broadcast %cst : f32 to vector<8x128xf32>
      %c0 = arith.constant 0 : index
      %c0_7 = arith.constant 0 : index
      %13 = vector.load %arg6[%c0, %c0_7] : memref<8x128xf32, #tpu.memory_space<vmem>>, vector<8x128xf32>
      tpu.vector_store %arg6[%c0, %c0_7], %12 {strides = array<i32>} : memref<8x128xf32, #tpu.memory_space<vmem>>, vector<8x128xf32>,
    } else {
    }
    %c0_i32_1 = arith.constant 0 : i32
    %3 = arith.cmpi slt, %arg1, %c0_i32_1 : i32
    %4 = arith.extui %3 : i1 to i32
    %c0_i32_2 = arith.constant 0 : i32
    %5 = arith.cmpi ne, %4, %c0_i32_2 : i32
    scf.if %5 {
      %c0 = arith.constant 0 : index
      %c0_7 = arith.constant 0 : index
      %12 = vector.load %arg3[%c0, %c0_7] : memref<8x128xf32, #tpu.memory_space<vmem>>, vector<8x128xf32>
      %13 = arith.index_cast %arg1 : i32 to index
      %c0_8 = arith.constant 0 : index
      %14 = vector.load %arg4[%13, %c0_8] : memref<1x128xf32, #tpu.memory_space<vmem>>, vector<1x128xf32>
      %15 = vector.broadcast %14 : vector<1x128xf32> to vector<8x128xf32>
      %16 = arith.mulf %12, %15 : vector<8x128xf32>
      %c0_9 = arith.constant 0 : index
      %c0_10 = arith.constant 0 : index
      %17 = vector.load %arg6[%c0_9, %c0_10] : memref<8x128xf32, #tpu.memory_space<vmem>>, vector<8x128xf32>
      %18 = arith.addf %17, %16 : vector<8x128xf32>
      %c0_11 = arith.constant 0 : index
      %c0_12 = arith.constant 0 : index
      %19 = vector.load %arg6[%c0_11, %c0_12] : memref<8x128xf32, #tpu.memory_space<vmem>>, vector<8x128xf32>
      tpu.vector_store %arg6[%c0_11, %c0_12], %18 {strides = array<i32>} : memref<8x128xf32, #tpu.memory_space<vmem>>, vector<8x128xf32>,
    } else {
    }
    %c0_i32_3 = arith.constant 0 : i32
    %6 = arith.cmpi eq, %arg1, %c0_i32_3 : i32
    %7 = arith.extui %6 : i1 to i32
    %c0_i32_4 = arith.constant 0 : i32
    %8 = arith.cmpi ne, %7, %c0_i32_4 : i32
    scf.if %8 {
      %c0 = arith.constant 0 : index
      %c0_7 = arith.constant 0 : index
      %12 = vector.load %arg3[%c0, %c0_7] : memref<8x128xf32, #tpu.memory_space<vmem>>, vector<8x128xf32>
      %13 = arith.index_cast %arg1 : i32 to index
      %c0_8 = arith.constant 0 : index
      %14 = vector.load %arg4[%13, %c0_8] : memref<1x128xf32, #tpu.memory_space<vmem>>, vector<1x128xf32>
      %15 = vector.broadcast %14 : vector<1x128xf32> to vector<8x128xf32>
      %16 = arith.mulf %12, %15 : vector<8x128xf32>
      %c128_i32 = arith.constant 128 : i32
      %17 = arith.muli %arg1, %c128_i32 : i32
      %c0_i32_9 = arith.constant 0 : i32
      %18 = arith.addi %17, %c0_i32_9 : i32
      %19 = tpu.iota {dimensions = array<i32: 1>} : vector<1x128xi32>
      %20 = vector.broadcast %18 : i32 to vector<1x128xi32>
      %21 = arith.addi %20, %19 : vector<1x128xi32>
      %c32_i32 = arith.constant 32 : i32
      %22 = vector.broadcast %c32_i32 : i32 to vector<1x128xi32>
      %23 = arith.cmpi slt, %21, %22 : vector<1x128xi32>
      %cst = arith.constant 0.000000e+00 : f32
      %24 = vector.shape_cast %23 : vector<1x128xi1> to vector<1x128xi1>
      %25 = vector.broadcast %24 : vector<1x128xi1> to vector<8x128xi1>
      %26 = vector.broadcast %cst : f32 to vector<8x128xf32>
      %27 = arith.select %25, %16, %26 : vector<8x128xi1>, vector<8x128xf32>
      %c0_10 = arith.constant 0 : index
      %c0_11 = arith.constant 0 : index
      %28 = vector.load %arg6[%c0_10, %c0_11] : memref<8x128xf32, #tpu.memory_space<vmem>>, vector<8x128xf32>
      %29 = arith.addf %28, %27 : vector<8x128xf32>
      %c0_12 = arith.constant 0 : index
      %c0_13 = arith.constant 0 : index
      %30 = vector.load %arg6[%c0_12, %c0_13] : memref<8x128xf32, #tpu.memory_space<vmem>>, vector<8x128xf32>
      tpu.vector_store %arg6[%c0_12, %c0_13], %29 {strides = array<i32>} : memref<8x128xf32, #tpu.memory_space<vmem>>, vector<8x128xf32>,
    } else {
    }
    %c0_i32_5 = arith.constant 0 : i32
    %9 = arith.cmpi eq, %arg1, %c0_i32_5 : i32
    %10 = arith.extui %9 : i1 to i32
    %c0_i32_6 = arith.constant 0 : i32
    %11 = arith.cmpi ne, %10, %c0_i32_6 : i32
    scf.if %11 {
      %c0 = arith.constant 0 : index
      %c0_7 = arith.constant 0 : index
      %12 = vector.load %arg6[%c0, %c0_7] : memref<8x128xf32, #tpu.memory_space<vmem>>, vector<8x128xf32>
      %cst = arith.constant dense<0.000000e+00> : vector<8xf32>
      %13 = vector.multi_reduction <add>, %12, %cst [1] : vector<8x128xf32> to vector<8xf32>
      %14 = vector.shape_cast %13 : vector<8xf32> to vector<8x1xf32>
      %c0_8 = arith.constant 0 : index
      %15 = memref.load %arg2[%c0_8] : memref<1xf32, #tpu.memory_space<smem>>
      %16 = vector.broadcast %15 : f32 to vector<8x1xf32>
      %17 = arith.addf %14, %16 : vector<8x1xf32>
      %c0_9 = arith.constant 0 : index
      %c0_10 = arith.constant 0 : index
      %18 = vector.load %arg5[%c0_9, %c0_10] : memref<8x1xf32, #tpu.memory_space<vmem>>, vector<8x1xf32>
      tpu.vector_store %arg5[%c0_9, %c0_10], %17 {strides = array<i32>} : memref<8x1xf32, #tpu.memory_space<vmem>>, vector<8x1xf32>,
    } else {
    }
    return
  }
  func.func @transform_0(%arg0: i32, %arg1: i32, %arg2: memref<1xf32, #tpu.memory_space<smem>>) -> (i32, i32) {
    %c0_i32 = arith.constant 0 : i32
    return %arg0, %arg1 : i32, i32
  }
  func.func @transform_1(%arg0: i32, %arg1: i32, %arg2: memref<1xf32, #tpu.memory_space<smem>>) -> (i32, i32) {
    %c0_i32 = arith.constant 0 : i32
    %c0_i32_0 = arith.constant 0 : i32
    %c0_i32_1 = arith.constant 0 : i32
    return %c0_i32, %c0_i32_0 : i32, i32
  }
  func.func @transform_2(%arg0: i32, %arg1: i32, %arg2: memref<1xf32, #tpu.memory_space<smem>>) -> (i32, i32) {
    %c0_i32 = arith.constant 0 : i32
    %c0_i32_0 = arith.constant 0 : i32
    return %arg0, %c0_i32 : i32, i32
  }
}

</mosaic_0001>

<bundles_post_ra>
// kernel: tpu_custom_call.1
= control target key start
LH: loop header
LB: loop body
LE: loop exit
PB: predicated region body
PF: predicated region fallthrough
CT: control target
= control target key end

     0   :  { %9 = vsyncpa [#allocation6], 0  ;;  %s108_s12 = smov [#allocation5]   ;;  %s141_s0 = inlined_call_operand.<no memory space> [shape: f32[1], index: 0, kind: input, shape index: {}]   ;;  %s142_s1 = inlined_call_operand.hbm [shape: f32[8,32], index: 1, kind: input, shape index: {}]   ;;  %s143_s2 = inlined_call_operand.vmem [shape: f32[1,128], index: 2, kind: input, shape index: {}]   ;;  %s144_s3 = inlined_call_operand.vmem [shape: f32[8,1], index: 3, kind: output, shape index: {}]  }
   0x1   :  { %s16_s13 = sshll.u32 %s108_s12, 4  ;;  %s17_s13 = int_to_ptr.vmem [resolvable:$true] %s16_s13 }
   0x2   :  { %s94_s14 = scalar_lea.vmem %s17_s13, 128  ;;  %p99_p1 = scmp.lt.s32.totalorder %s17_s13, %s17_s13 }
   0x3   :  { %p95_p0 = scmp.ne.s32.totalorder %s17_s13, %s94_s14  ;;  %p100_p2 = scmp.lt.s32.totalorder %s94_s14, %s94_s14 }
   0x5   :  { %p101_p3 = por %p100_p2, %p99_p1 }
   0x7   :  { %p102_p4 = pnand %p101_p3, %p95_p0 }
   0x9   :  { %105 = shalt.err (!%p102_p4)
}
   0xa   :  { %19 = dma.hbm_to_vmem [thread:$0]  %s142_s1, 128, %s17_s13, [#allocation6]  }
   0xb   :  { %106 = dma.done.wait [#allocation6], 128  }
   0xc   :  { %107 = vsyncadd [#allocation6], 4294967168  ;;  %v59_v0 = vlaneseq  ;;  %v49_v2 = vld [vmem:[#allocation5] sm:$0xff]  ;;  %v74_v6 = vstv %s141_s0  ;;  %vm76_vm1 = vcmask 7168  }
   0xd   :  { %v84_v3 = vld [vmem:[%s143_s2] ss:$0 sm:$0xff] }
   0xe   :  { %v60_v1 = vand.u32 127, %v59_v0  ;;  %v57_v4 = vmul.f32 %v84_v3, %v49_v2 }
  0x10   :  { %vm63_vm0 = vcmp.lt.s32.totalorder %v60_v1, 32 }
  0x11   :  { %v66_v5 = vsel %vm63_vm0, %v57_v4, 0.0 }
  0x12   :  { %71 = vadd.xlane.f32.xlu0 %v66_v5 }
  0x9b   :  { %v72_v7 = vpop.xlane.xlu0 %71 }
  0x9c   :  { %v75_v8 = vadd.f32 %v74_v6, %v72_v7 }
  0x9e   :  { %77 = vst.msk [vmem:[%s144_s3] sm:$0xff] %vm76_vm1, %v75_v8 }
  0x9f   :  { %82 = vsyncpa [#allocation6], 1 }

</bundles_post_ra>
